<compile_context>
chip_gen: v7x
topology: tpu7x:2x2x1
jax: 0.10.0
libtpu: 0.0.40
codegen_flags: <defaults>
</compile_context>

<pallas_src>
import functools
from typing import NamedTuple

import jax
import jax.numpy as jnp
from jax.experimental import pallas as pl
from jax.experimental.pallas import tpu as pltpu


def _apply_act(h, activation):
    if activation == "tanh":
        return jnp.tanh(h)
    if activation == "relu":
        return jnp.maximum(h, 0.0)
    if activation == "sigmoid":
        return jax.nn.sigmoid(h)
    raise ValueError(f"Unsupported activation: {activation}")


def _mlp_kernel(num_layers, activation, matmul_dtype,
                xt_ref, w_ref, b_ref, out_ref):
    """Feature-major MLP forward on one lane-tile of the batch.

    xt_ref : (2, tile)            row 0 = x, row 1 = t (batch in the lane dim)
    w_ref  : (max(1,L-1), D, D)   zero-padded torch-layout weights, layers 1..L-1
    b_ref  : (L+2, D, 1)          rows 0..L-1 biases; rows L, L+1 hold the two
                                  layer-0 weight columns (x-col, t-col)
    out_ref: (1, tile)            u(x, t), lane-dense store
    """
    L = num_layers
    x = xt_ref[0:1, :]                       # (1, tile)
    t = xt_ref[1:2, :]                       # (1, tile)

    # Layer 0 (fan_in == 2): two lane-broadcast FMAs on the VPU; its weight
    # columns live in the bias buffer so no lane-slice of a wide tile is needed.
    wx = b_ref[L]                            # (D, 1)
    wt = b_ref[L + 1]                        # (D, 1)
    h = wx * x + wt * t + b_ref[0]           # (D, tile)
    if L > 1:
        h = _apply_act(h, activation)

    for l in range(1, L):
        is_last = (l == L - 1)
        if is_last:
            # True fan_out is 1: use only the first sublane block (8 rows) of
            # the padded slab -> 4x fewer MXU pushes for this layer.
            w = w_ref[l - 1, 0:8, :]         # (8, D)
            b = b_ref[l, 0:8, :]             # (8, 1)
        else:
            w = w_ref[l - 1]                 # (D, D)
            b = b_ref[l]                     # (D, 1)
        h = jnp.dot(w.astype(matmul_dtype), h.astype(matmul_dtype),
                    preferred_element_type=jnp.float32) + b
        if not is_last:
            h = _apply_act(h, activation)

    # Row 0 is the real output.  Padded feature rows stay exactly zero: padded
    # weight rows / biases are zero, and padded weight *columns* kill any
    # nonzero-at-zero activation value (e.g. sigmoid(0)=0.5) from propagating.
    out_ref[...] = h[0:1, :].astype(out_ref.dtype)


class PackedPINN(NamedTuple):
    w_hidden: jax.Array      # (max(1, L-1), D, D) f32, layers 1..L-1
    b_aux: jax.Array         # (L+2, D, 1) f32, biases + layer-0 weight columns
    num_layers: int
    d: int


def pack_pinn_params(params):
    """Pack torch-layout params once (hoisted out of the forward path).

    params: list of (W, b), W:(fan_out, fan_in), b:(fan_out,).
    """
    num_layers = len(params)
    dims = [int(w.shape[0]) for (w, _) in params] + [2]
    d = max(8, -(-max(dims) // 8) * 8)                 # round up to sublane mult
    nw = max(1, num_layers - 1)
    w_hidden = jnp.zeros((nw, d, d), jnp.float32)
    b_aux = jnp.zeros((num_layers + 2, d, 1), jnp.float32)
    for l, (w, b) in enumerate(params):
        w = jnp.asarray(w, jnp.float32)
        b = jnp.asarray(b, jnp.float32).reshape(-1)
        od, idim = w.shape
        b_aux = b_aux.at[l, :od, 0].set(b)
        if l == 0:
            # fold layer-0 weight columns into unused rows of the bias buffer
            b_aux = b_aux.at[num_layers, :od, 0].set(w[:, 0])
            b_aux = b_aux.at[num_layers + 1, :od, 0].set(w[:, 1])
        else:
            w_hidden = w_hidden.at[l - 1, :od, :idim].set(w)
    return PackedPINN(w_hidden, b_aux, num_layers, d)


def _pick_tile(n, max_tile=8192):
    """Lane-aligned batch tile.

    Targets an EVEN grid-step count (>= 2) so v7x's two TensorCores split the
    work evenly, with tiles up to 8192 lanes to amortize the ~0.35us/step
    pipeline overhead.  At 8192 lanes the working set is a few MB, well under
    v5e's 16 MiB scoped-VMEM default, so no vmem_limit override is required.
    """
    chunks = -(-n // 128)                    # 128-lane chunks needed
    if chunks <= 1:
        return 128
    if chunks * 128 <= max_tile:
        return int(-(-chunks // 2) * 128)    # split whole batch into 2 tiles
    steps = 2
    while -(-chunks // steps) * 128 > max_tile:
        steps += 2
    return int(-(-chunks // steps) * 128)


def pinn_forward(x, t, params, activation="tanh", tile_n=None,
                 matmul_dtype=jnp.float32):
    """Pallas forward pass of the PINN.

    x, t   : (N, 1) (or (N,)) float arrays.
    params : PackedPINN (preferred; pack once with pack_pinn_params) or a raw
             list of torch-layout (W, b) pairs.
    matmul_dtype: jnp.float32 (default, exact) or jnp.bfloat16 (faster MXU
             path on v6e/v7x; breaks 1e-5 tolerance -> opt-in).
    Returns u(x, t) with shape (N, 1), float32.
    """
    if not isinstance(params, PackedPINN):
        params = pack_pinn_params(params)

    x = jnp.asarray(x, jnp.float32).reshape(-1)
    t = jnp.asarray(t, jnp.float32).reshape(-1)
    n = x.shape[0]
    L, d = params.num_layers, params.d
    nw = params.w_hidden.shape[0]

    if tile_n is None:
        tile_n = _pick_tile(n)
    n_pad = pl.cdiv(n, tile_n) * tile_n
    pad = n_pad - n
    xt = jnp.stack([jnp.pad(x, (0, pad)), jnp.pad(t, (0, pad))], axis=0)  # (2, n_pad)

    kernel = functools.partial(_mlp_kernel, L, activation, matmul_dtype)

    out = pl.pallas_call(
        kernel,
        out_shape=jax.ShapeDtypeStruct((1, n_pad), jnp.float32),
        grid_spec=pltpu.PrefetchScalarGridSpec(
            num_scalar_prefetch=0,
            grid=(n_pad // tile_n,),
            in_specs=[
                pl.BlockSpec((2, tile_n), lambda i: (0, i)),            # x|t
                pl.BlockSpec((nw, d, d), lambda i: (0, 0, 0)),          # W (resident)
                pl.BlockSpec((L + 2, d, 1), lambda i: (0, 0, 0)),       # b + w0 cols
            ],
            out_specs=pl.BlockSpec((1, tile_n), lambda i: (0, i)),
        ),
        compiler_params=pltpu.CompilerParams(
            dimension_semantics=("parallel",)
        ),
    )(xt, params.w_hidden, params.b_aux)

    return out.reshape(-1)[:n].reshape(n, 1)


def init_pinn_params(key, hidden_layers):
    """Deterministic init mimicking torch nn.Linear default U(-1/sqrt(fan_in), .)."""
    dims = [2] + list(hidden_layers) + [1]
    params = []
    for fan_in, fan_out in zip(dims[:-1], dims[1:]):
        key, kw, kb = jax.random.split(key, 3)
        bound = 1.0 / jnp.sqrt(float(fan_in))
        w = jax.random.uniform(kw, (fan_out, fan_in), jnp.float32, -bound, bound)
        b = jax.random.uniform(kb, (fan_out,), jnp.float32, -bound, bound)
        params.append((w, b))
    return params


def pinn_forward_ref(x, t, params, activation="tanh"):
    """Pure-JAX reference (for correctness sanity check only)."""
    act = {"tanh": jnp.tanh,
           "relu": lambda v: jnp.maximum(v, 0.0),
           "sigmoid": jax.nn.sigmoid}[activation]
    h = jnp.concatenate([x, t], axis=1).astype(jnp.float32)
    for l, (w, b) in enumerate(params):
        h = h @ w.T + b
        if l < len(params) - 1:
            h = act(h)
    return h


# TODO(synk): compute_derivatives (autograd u_t, u_x, u_xx) is a reverse-mode
# AD construct; it can be obtained with jax.grad/jax.jvp over this forward but
# is not itself a single Pallas kernel, so it is not implemented here.

if __name__ == "__main__":
    key = jax.random.PRNGKey(0)
    hidden_layers = [32, 32, 32]
    params = init_pinn_params(key, hidden_layers)
    packed = pack_pinn_params(params)          # pack ONCE, outside the forward

    N = 256
    kx, kt = jax.random.split(jax.random.PRNGKey(0), 2)
    x = jax.random.uniform(kx, (N, 1), jnp.float32)   # spatial coords
    t = jax.random.uniform(kt, (N, 1), jnp.float32)   # temporal coords

    u = pinn_forward(x, t, packed, activation="tanh")
    u = jax.block_until_ready(u)

    u_ref = pinn_forward_ref(x, t, params, activation="tanh")
    assert u.shape == (N, 1)
    assert jnp.allclose(u, u_ref, atol=1e-5, rtol=1e-5)

    print("KERNEL_OK")
</pallas_src>

<mosaic_0001>
module attributes {stable_mosaic.version = 11 : i64} {
  func.func @_mlp_kernel(%arg0: i32, %arg1: memref<2x128xf32, #tpu.memory_space<vmem>>, %arg2: memref<3x32x32xf32, #tpu.memory_space<vmem>>, %arg3: memref<6x32x1xf32, #tpu.memory_space<vmem>>, %arg4: memref<1x128xf32, #tpu.memory_space<vmem>>) attributes {dimension_semantics = [#tpu.dimension_semantics<parallel>], iteration_bounds = array<i64: 2>, scalar_prefetch = 0 : i64, scratch_operands = 0 : i64, tpu.core_type = #tpu.core_type<tc>, window_params = [{transform_indices = @transform_0, window_bounds = array<i64: 2, 128>}, {pipeline_mode = #tpu.pipeline_mode<synchronous>, transform_indices = @transform_1, window_bounds = array<i64: 3, 32, 32>}, {pipeline_mode = #tpu.pipeline_mode<synchronous>, transform_indices = @transform_2, window_bounds = array<i64: 6, 32, 1>}, {transform_indices = @transform_3, window_bounds = array<i64: 1, 128>}]} {
    %c0 = arith.constant 0 : index
    %c0_0 = arith.constant 0 : index
    %0 = vector.load %arg1[%c0, %c0_0] : memref<2x128xf32, #tpu.memory_space<vmem>>, vector<1x128xf32>
    %c1 = arith.constant 1 : index
    %c0_1 = arith.constant 0 : index
    %1 = vector.load %arg1[%c1, %c0_1] : memref<2x128xf32, #tpu.memory_space<vmem>>, vector<1x128xf32>
    %c4 = arith.constant 4 : index
    %c0_2 = arith.constant 0 : index
    %c0_3 = arith.constant 0 : index
    %2 = vector.load %arg3[%c4, %c0_2, %c0_3] : memref<6x32x1xf32, #tpu.memory_space<vmem>>, vector<1x32x1xf32>
    %3 = vector.shape_cast %2 : vector<1x32x1xf32> to vector<32x1xf32>
    %c5 = arith.constant 5 : index
    %c0_4 = arith.constant 0 : index
    %c0_5 = arith.constant 0 : index
    %4 = vector.load %arg3[%c5, %c0_4, %c0_5] : memref<6x32x1xf32, #tpu.memory_space<vmem>>, vector<1x32x1xf32>
    %5 = vector.shape_cast %4 : vector<1x32x1xf32> to vector<32x1xf32>
    %6 = vector.broadcast %3 : vector<32x1xf32> to vector<32x128xf32>
    %7 = vector.broadcast %0 : vector<1x128xf32> to vector<32x128xf32>
    %8 = arith.mulf %6, %7 : vector<32x128xf32>
    %9 = vector.broadcast %5 : vector<32x1xf32> to vector<32x128xf32>
    %10 = vector.broadcast %1 : vector<1x128xf32> to vector<32x128xf32>
    %11 = arith.mulf %9, %10 : vector<32x128xf32>
    %12 = arith.addf %8, %11 : vector<32x128xf32>
    %c0_6 = arith.constant 0 : index
    %c0_7 = arith.constant 0 : index
    %c0_8 = arith.constant 0 : index
    %13 = vector.load %arg3[%c0_6, %c0_7, %c0_8] : memref<6x32x1xf32, #tpu.memory_space<vmem>>, vector<1x32x1xf32>
    %14 = vector.shape_cast %13 : vector<1x32x1xf32> to vector<32x1xf32>
    %15 = vector.broadcast %14 : vector<32x1xf32> to vector<32x128xf32>
    %16 = arith.addf %12, %15 : vector<32x128xf32>
    %17 = math.tanh %16 : vector<32x128xf32>
    %c0_9 = arith.constant 0 : index
    %c0_10 = arith.constant 0 : index
    %c0_11 = arith.constant 0 : index
    %18 = vector.load %arg2[%c0_9, %c0_10, %c0_11] : memref<3x32x32xf32, #tpu.memory_space<vmem>>, vector<1x32x32xf32>
    %19 = vector.shape_cast %18 : vector<1x32x32xf32> to vector<32x32xf32>
    %c1_12 = arith.constant 1 : index
    %c0_13 = arith.constant 0 : index
    %c0_14 = arith.constant 0 : index
    %20 = vector.load %arg3[%c1_12, %c0_13, %c0_14] : memref<6x32x1xf32, #tpu.memory_space<vmem>>, vector<1x32x1xf32>
    %21 = vector.shape_cast %20 : vector<1x32x1xf32> to vector<32x1xf32>
    %cst = arith.constant dense<0.000000e+00> : vector<32x128xf32>
    %22 = tpu.matmul %19, %17, %cst {dimension_numbers = #tpu.dot_dimension_numbers<[1], [0], [0], [1], [0, 0, 1, 1], [], []>} : vector<32x32xf32>, vector<32x128xf32>, vector<32x128xf32> -> vector<32x128xf32>
    %23 = vector.broadcast %21 : vector<32x1xf32> to vector<32x128xf32>
    %24 = arith.addf %22, %23 : vector<32x128xf32>
    %25 = math.tanh %24 : vector<32x128xf32>
    %c1_15 = arith.constant 1 : index
    %c0_16 = arith.constant 0 : index
    %c0_17 = arith.constant 0 : index
    %26 = vector.load %arg2[%c1_15, %c0_16, %c0_17] : memref<3x32x32xf32, #tpu.memory_space<vmem>>, vector<1x32x32xf32>
    %27 = vector.shape_cast %26 : vector<1x32x32xf32> to vector<32x32xf32>
    %c2 = arith.constant 2 : index
    %c0_18 = arith.constant 0 : index
    %c0_19 = arith.constant 0 : index
    %28 = vector.load %arg3[%c2, %c0_18, %c0_19] : memref<6x32x1xf32, #tpu.memory_space<vmem>>, vector<1x32x1xf32>
    %29 = vector.shape_cast %28 : vector<1x32x1xf32> to vector<32x1xf32>
    %cst_20 = arith.constant dense<0.000000e+00> : vector<32x128xf32>
    %30 = tpu.matmul %27, %25, %cst_20 {dimension_numbers = #tpu.dot_dimension_numbers<[1], [0], [0], [1], [0, 0, 1, 1], [], []>} : vector<32x32xf32>, vector<32x128xf32>, vector<32x128xf32> -> vector<32x128xf32>
    %31 = vector.broadcast %29 : vector<32x1xf32> to vector<32x128xf32>
    %32 = arith.addf %30, %31 : vector<32x128xf32>
    %33 = math.tanh %32 : vector<32x128xf32>
    %c2_21 = arith.constant 2 : index
    %c0_22 = arith.constant 0 : index
    %c0_23 = arith.constant 0 : index
    %34 = vector.load %arg2[%c2_21, %c0_22, %c0_23] : memref<3x32x32xf32, #tpu.memory_space<vmem>>, vector<1x8x32xf32>
    %35 = vector.shape_cast %34 : vector<1x8x32xf32> to vector<8x32xf32>
    %c3 = arith.constant 3 : index
    %c0_24 = arith.constant 0 : index
    %c0_25 = arith.constant 0 : index
    %36 = vector.load %arg3[%c3, %c0_24, %c0_25] : memref<6x32x1xf32, #tpu.memory_space<vmem>>, vector<1x8x1xf32>
    %37 = vector.shape_cast %36 : vector<1x8x1xf32> to vector<8x1xf32>
    %cst_26 = arith.constant dense<0.000000e+00> : vector<8x128xf32>
    %38 = tpu.matmul %35, %33, %cst_26 {dimension_numbers = #tpu.dot_dimension_numbers<[1], [0], [0], [1], [0, 0, 1, 1], [], []>} : vector<8x32xf32>, vector<32x128xf32>, vector<8x128xf32> -> vector<8x128xf32>
    %39 = vector.broadcast %37 : vector<8x1xf32> to vector<8x128xf32>
    %40 = arith.addf %38, %39 : vector<8x128xf32>
    %41 = vector.extract_strided_slice %40 {offsets = [0, 0], sizes = [1, 128], strides = [1, 1]} : vector<8x128xf32> to vector<1x128xf32>
    %c0_27 = arith.constant 0 : index
    %c0_28 = arith.constant 0 : index
    %42 = vector.load %arg4[%c0_27, %c0_28] : memref<1x128xf32, #tpu.memory_space<vmem>>, vector<1x128xf32>
    tpu.vector_store %arg4[%c0_27, %c0_28], %41 {strides = array<i32>} : memref<1x128xf32, #tpu.memory_space<vmem>>, vector<1x128xf32>,
    return
  }
  func.func @transform_0(%arg0: i32) -> (i32, i32) {
    %c0_i32 = arith.constant 0 : i32
    %c0_i32_0 = arith.constant 0 : i32
    return %c0_i32, %arg0 : i32, i32
  }
  func.func @transform_1(%arg0: i32) -> (i32, i32, i32) {
    %c0_i32 = arith.constant 0 : i32
    %c0_i32_0 = arith.constant 0 : i32
    %c0_i32_1 = arith.constant 0 : i32
    %c0_i32_2 = arith.constant 0 : i32
    return %c0_i32, %c0_i32_0, %c0_i32_1 : i32, i32, i32
  }
  func.func @transform_2(%arg0: i32) -> (i32, i32, i32) {
    %c0_i32 = arith.constant 0 : i32
    %c0_i32_0 = arith.constant 0 : i32
    %c0_i32_1 = arith.constant 0 : i32
    %c0_i32_2 = arith.constant 0 : i32
    return %c0_i32, %c0_i32_0, %c0_i32_1 : i32, i32, i32
  }
  func.func @transform_3(%arg0: i32) -> (i32, i32) {
    %c0_i32 = arith.constant 0 : i32
    %c0_i32_0 = arith.constant 0 : i32
    return %c0_i32, %arg0 : i32, i32
  }
}

</mosaic_0001>

<bundles_post_ra>
// kernel: tpu_custom_call.1
= control target key start
LH: loop header
LB: loop body
LE: loop exit
PB: predicated region body
PF: predicated region fallthrough
CT: control target
= control target key end

     0   :  { %8 = vsyncpa [#allocation3], 0  ;;  %s1162_s0 = inlined_call_operand.vmem [shape: f32[2,256], index: 0, kind: input, shape index: {}]   ;;  %s1163_s1 = inlined_call_operand.vmem [shape: f32[3,32,32], index: 1, kind: input, shape index: {}]   ;;  %s1164_s2 = inlined_call_operand.vmem [shape: f32[6,32,1], index: 2, kind: input, shape index: {}]   ;;  %s1165_s3 = inlined_call_operand.hbm [shape: f32[1,256], index: 3, kind: output, shape index: {}]  }
   0x1   :  { %10 = vsyncpa [#allocation3 + $0x1], 0  ;;  %s963_s12 = smov 0   ;;  %s965_s13 = smov 0  }
   0x2   :  { %s967_s14 = smov 0   ;;  %s969_s15 = smov 0  }
   0x3 LB: > { %s984_s16 = sadd.s32 4294967295, %s936_s15   ;;  %s682_s17 = sadd.s32 4294967294, %s936_s15   ;;  %s936_s15 = sphi %s969_s15, %s1171_s15   ;;  %s932_s14 = sphi %s967_s14, %s1170_s14   ;;  %s928_s13 = sphi %s965_s13, %s1169_s13   ;;  %s924_s12 = sphi %s963_s12, %s1168_s12  }
   0x4   : > { %s988_s18 = sadd.s32 1, %s936_s15   ;;  %s91_s19 = sadd.s32 1, %s932_s14 }
   0x5   : > { %s88_s20 = ssub.s32 %s936_s15, %s988_s18  ;;  %p101_p0 = scmp.ne.s32.totalorder %s932_s14, %s928_s13 }
   0x6   : > { %p89_p1 = scmp.eq.s32.totalorder %s88_s20, 0  ;;  %p102_p2 = scmp.eq.s32.totalorder %s984_s16, 1 }
   0x7   : > { %p107_p3 = scmp.ne.s32.totalorder %s928_s13, %s924_s12  ;;  %p108_p4 = scmp.eq.s32.totalorder %s682_s17, 1 }
   0x8   : > { %s999_s21 = scalar_select %p89_p1, %s932_s14, %s91_s19  }
   0x9   : > { %p1001_p5 = por %p102_p2, %p101_p0  ;;  %p1005_p6 = por %p108_p4, %p107_p3 }
   0xa   : > { %p685_p7 = scmp.ge.s32.totalorder %s936_s15, 1  ;;  %p139_p8 = scmp.lt.s32.totalorder %s936_s15, 3 }
   0xc   : > { %p140_p9 = pnand %p685_p7, %p139_p8 }
   0xd   : > { %v691_v0 = vld [vmem:[%s1164_s2 + $0xa0] sm:$0xff] (!%p140_p9)  ;;  %v938_v2 = vmov (!%p140_p9), 0   ;;  %v692_v3 = vld [vmem:[%s1164_s2 + $0xa8] sm:$0xff] (!%p140_p9)  ;;  %v690_v5 = vld [vmem:[%s1164_s2 + $0x98] sm:$0xff] (!%p140_p9)  ;;  %vm298_vm0 = vcmask (!%p140_p9), 261120   ;;  %p161_p10 = scmp.lt.s32.totalorder (!%p140_p9), %s984_s16, 1 }
   0xe   : > { %143 = sbr.rel (%p140_p9) target bundleno = 882 (0x372), region = 32  ;;  %v687_v1 = vld [vmem:[%s1164_s2 + $0x80] sm:$0xff] (!%p140_p9)  ;;  %849 = vset.pattern.permute.xlu1 (!%p140_p9), %v938_v2  ;;  %848 = vset.pattern.permute.xlu0 (!%p140_p9), %v938_v2  ;;  %v688_v4 = vld [vmem:[%s1164_s2 + $0x88] sm:$0xff] (!%p140_p9)  ;;  %v689_v6 = vld [vmem:[%s1164_s2 + $0x90] sm:$0xff] (!%p140_p9)  ;;  %vm940_vm1 = vmmov (!%p140_p9), 0   ;;  %s159_s8 = sand.u32 (!%p140_p9), 1, %s928_s13  }
   0xf   : > { %207 = vperm.xlu1 (!%p140_p9), %849, %v691_v0   ;;  %179 = vperm.xlu0 (!%p140_p9), %848, %v687_v1   ;;  %v694_v7 = vld [vmem:[%s1164_s2 + $0xb8] sm:$0xff] (!%p140_p9)  ;;  %v693_v8 = vld [vmem:[%s1164_s2 + $0xb0] sm:$0xff] (!%p140_p9)  ;;  %v238_v9 = vld [vmem:[%s1164_s2 + $0x8] sm:$0xff] (!%p140_p9)  ;;  %s160_s10 = scalar_lea.vmem (!%p140_p9), [#allocation2], %s159_s8  ;;  %s615_s24 = scalar_lea.sflag (!%p140_p9), [#allocation3], %s159_s8 }
  0x10   : > { %v237_v10 = vld [vmem:[%s1164_s2] sm:$0xff] (!%p140_p9)  ;;  %v240_v11 = vld [vmem:[%s1164_s2 + $0x18] sm:$0xff] (!%p140_p9)  ;;  %v239_v12 = vld [vmem:[%s1164_s2 + $0x10] sm:$0xff] (!%p140_p9)  ;;  %s627_s11 = sshll.u32 (!%p140_p9), %s160_s10, 4  ;;  %s1122_s11 = int_to_ptr.vmem [resolvable:$true] %s627_s11 }
  0x11   : > { %v698_v13 = vld [vmem:[%s1164_s2 + $0x28] sm:$0xff] (!%p140_p9)  ;;  %v697_v14 = vld [vmem:[%s1164_s2 + $0x20] sm:$0xff] (!%p140_p9)  ;;  %v700_v15 = vld [vmem:[%s1164_s2 + $0x38] sm:$0xff] (!%p140_p9)  ;;  %s874_s25 = scalar_lea.vmem (!%p140_p9), %s1122_s11, 16 }
  0x12   : > { %v699_v16 = vld [vmem:[%s1164_s2 + $0x30] sm:$0xff] (!%p140_p9)  ;;  %v710_v17 = vld [vmem:[%s1164_s2 + $0x48] sm:$0xff] (!%p140_p9)  ;;  %v709_v18 = vld [vmem:[%s1164_s2 + $0x40] sm:$0xff] (!%p140_p9)  ;;  %p875_p11 = scmp.ne.s32.totalorder (!%p140_p9), %s1122_s11, %s874_s25 }
  0x13   : > { %212 = vperm.xlu1 (!%p140_p9), %849, %v692_v3   ;;  %184 = vperm.xlu0 (!%p140_p9), %848, %v688_v4   ;;  %v712_v19 = vld [vmem:[%s1164_s2 + $0x58] sm:$0xff] (!%p140_p9)  ;;  %v711_v20 = vld [vmem:[%s1164_s2 + $0x50] sm:$0xff] (!%p140_p9)  ;;  %v718_v21 = vld [vmem:[%s1164_s2 + $0x60] sm:$0xff] (!%p140_p9) }
  0x14   : > { %v269_v22 = vld [vmem:[%s1163_s1] sm:$0xff] (!%p140_p9)  ;;  %v270_v59 = vld [vmem:[%s1163_s1 + $0x8] sm:$0xff] (!%p140_p9)  ;;  %v271_v60 = vld [vmem:[%s1163_s1 + $0x10] sm:$0xff] (!%p140_p9)  ;;  %p876_p12 = pnand (!%p140_p9), %p875_p11, %p1001_p5 }
  0x15   : > { %752 = vmatprep.mubr.msk.f32.mxu0 %vm298_vm0, %v269_v22  ;;  %s162_s5 = scalar_select %p161_p10, %s984_s16, 1  ;;  %v272_v61 = vld [vmem:[%s1163_s1 + $0x18] sm:$0xff]  ;;  %v705_v62 = vld [vmem:[%s1163_s1 + $0x20] sm:$0xff] }
  0x16   : > { %766 = vmatprep.mubr.msk.f32.mxu1 %vm298_vm0, %v705_v62  ;;  %p877_p13 = pneg %p876_p12 }
  0x17   : > { %194 = vperm.xlu1 %849, %v690_v5   ;;  %189 = vperm.xlu0 %848, %v689_v6   ;;  %s686_s6 = sshll.u32 %s162_s5, 1 }
  0x18   : > { %s164_s9 = scalar_lea.vmem %s1162_s0, %s686_s6 }
  0x19   : > { %v696_v27 = vld [vmem:[%s164_s9 + $0x1] ss:$0 sm:$0xff]  ;;  %v695_v28 = vld [vmem:[%s164_s9] ss:$0 sm:$0xff]  ;;  %s720_s9 = sshll.u32 %s984_s16, 4  ;;  %s942_s16 = smov [#allocation2]  }
  0x1a   : > { %s1120_s20 = scalar_lea.hbm %s1165_s3, %s720_s9  ;;  %s878_s26 = sshll.u32 %s942_s16, 4  ;;  %s879_s26 = int_to_ptr.vmem [resolvable:$false] %s878_s26 }
  0x1b   : > { %222 = vperm.xlu1 %849, %v694_v7   ;;  %217 = vperm.xlu0 %848, %v693_v8   ;;  %s880_s27 = scalar_lea.vmem %s879_s26, 32  ;;  %p881_p0 = scmp.lt.s32.totalorder %s1122_s11, %s879_s26 }
  0x1c   : > { %p882_p1 = scmp.lt.s32.totalorder %s880_s27, %s874_s25 }
  0x1e   : > { %p883_p2 = por %p882_p1, %p881_p0 }
  0x1f   : > { %248 = vperm.xlu1 %849, %v238_v9   ;;  %243 = vperm.xlu0 %848, %v237_v10  }
  0x20   : > { %p884_p3 = pnand %p883_p2, %p877_p13 }
  0x23   : > { %258 = vperm.xlu1 %849, %v240_v11   ;;  %253 = vperm.xlu0 %848, %v239_v12  }
  0x27   : > { %285 = vperm.xlu1 %849, %v698_v13   ;;  %280 = vperm.xlu0 %848, %v697_v14  }
  0x2b   : > { %295 = vperm.xlu1 %849, %v700_v15   ;;  %290 = vperm.xlu0 %848, %v699_v16  }
  0x2f   : > { %417 = vperm.xlu1 %849, %v710_v17   ;;  %412 = vperm.xlu0 %848, %v709_v18   ;;  %v706_v17 = vld [vmem:[%s1163_s1 + $0x28] sm:$0xff]  ;;  %v707_v18 = vld [vmem:[%s1163_s1 + $0x30] sm:$0xff] }
  0x33   : > { %427 = vperm.xlu1 %849, %v712_v19   ;;  %422 = vperm.xlu0 %848, %v711_v20   ;;  %v708_v19 = vld [vmem:[%s1163_s1 + $0x38] sm:$0xff]  ;;  %v939_v20 = vmov 0.0|0.0  }
  0x37   : > { %537 = vperm.xlu0 %848, %v718_v21   ;;  %v941_v21 = vmov 0.0  }
  0x8e   : > { %v208_v23 = vpop.permute.xlu1 %207  ;;  %v180_v24 = vpop.permute.xlu0 %179 }
  0x8f   : > { %v229_v31 = vmul.f32 %v696_v27, %v208_v23  ;;  %v201_v32 = vmul.f32 %v695_v28, %v180_v24 }
  0x91   : > { %v233_v40 = vadd.f32 %v229_v31, %v201_v32 }
  0x92   : > { %v213_v25 = vpop.permute.xlu1 %212  ;;  %v185_v26 = vpop.permute.xlu0 %184 }
  0x93   : > { %v230_v33 = vmul.f32 %v696_v27, %v213_v25  ;;  %v202_v34 = vmul.f32 %v695_v28, %v185_v26 }
  0x95   : > { %v234_v39 = vadd.f32 %v230_v33, %v202_v34 }
  0x96   : > { %v195_v29 = vpop.permute.xlu1 %194  ;;  %v190_v30 = vpop.permute.xlu0 %189 }
  0x97   : > { %v204_v43 = vmul.f32 %v695_v28, %v195_v29  ;;  %v203_v44 = vmul.f32 %v695_v28, %v190_v30 }
  0x9a   : > { %v223_v35 = vpop.permute.xlu1 %222  ;;  %v218_v36 = vpop.permute.xlu0 %217 }
  0x9b   : > { %v232_v37 = vmul.f32 %v696_v27, %v223_v35  ;;  %v231_v38 = vmul.f32 %v696_v27, %v218_v36 }
  0x9d   : > { %v236_v47 = vadd.f32 %v232_v37, %v204_v43  ;;  %v235_v48 = vadd.f32 %v231_v38, %v203_v44 }
  0x9e   : > { %v249_v41 = vpop.permute.xlu1 %248  ;;  %v244_v42 = vpop.permute.xlu0 %243 }
  0x9f   : > { %v262_v45 = vadd.f32 %v249_v41, %v234_v39  ;;  %v261_v46 = vadd.f32 %v244_v42, %v233_v40  ;;  %v717_v40 = vld [vmem:[%s1163_s1 + $0x40] sm:$0xff] }
  0xa1   : > { %850 = vtanh.f32 %v262_v45 }
  0xa2   : > { %852 = vtanh.f32 %v261_v46  ;;  %v259_v49 = vpop.permute.xlu1 %258  ;;  %v254_v50 = vpop.permute.xlu0 %253 }
  0xa3   : > { %v264_v51 = vadd.f32 %v259_v49, %v236_v47  ;;  %v263_v52 = vadd.f32 %v254_v50, %v235_v48 }
  0xa5   : > { %854 = vtanh.f32 %v264_v51 }
  0xa6   : > { %856 = vtanh.f32 %v263_v52  ;;  %v286_v63 = vpop.permute.xlu1 %285  ;;  %v281_v0 = vpop.permute.xlu0 %280 }
  0xaa   : > { %v296_v5 = vpop.permute.xlu1 %295  ;;  %v291_v7 = vpop.permute.xlu0 %290 }
  0xab   : > { %v851_v53 = vpop.eup %850 }
  0xac   : > { %v853_v54 = vpop.eup %852 }
  0xad   : > { %v783_v55 = vpack.c.bf16 %v851_v53, %v853_v54 }
  0xae   : > { %v418_v22 = vpop.permute.xlu1 %417  ;;  %v413_v23 = vpop.permute.xlu0 %412 }
  0xaf   : > { %v855_v56 = vpop.eup %854  ;;  %784 = vmatprep.subr.bf16.mxu0 %v783_v55 }
  0xb0   : > { %v857_v57 = vpop.eup %856  ;;  %786 = vmatpush3.bf16.msra.mxu0 %v783_v55 }
  0xb1   : > { %v787_v58 = vpack.c.bf16 %v855_v56, %v857_v57 }
  0xb2   : > { %v428_v28 = vpop.permute.xlu1 %427  ;;  %v423_v30 = vpop.permute.xlu0 %422 }
  0xb3   : > { %788 = vmatprep.subr.bf16.mxu0 %v787_v58 }
  0xb4   : > { %790 = vmatpush3.bf16.msra.mxu0 %v787_v58 }
  0xb5   : > { %799 = vmatprep.subr.bf16.mxu0 %v939_v20 }
  0xb6   : > { %v538_v41 = vpop.permute.xlu0 %537 }
  0xb7   : > { %753 = vmatmul.mubr.msk.f32.vlgmr.msra.gmra.mrb[0].mxu0 %vm298_vm0, %v270_v59 }
  0xb8   : > { %755 = vmatprep.mubr.msk.f32.mxu0 %vm298_vm0, %v271_v60 }
  0xbb   : > { %756 = vmatmul.mubr.msk.f32.gmra.mrb[2].mxu0 %vm298_vm0, %v272_v61 }
  0xbc   : > { %780 = vmatprep.mubr.msk.f32.mxu0 %vm940_vm1, %v941_v21 }
 0x18a   : > { %v754_v1 = vpop.f32.mrb[0].mxu0 }
 0x18b   : > { %v383_v2 = vadd.f32 %v754_v1, %v286_v63  ;;  %v377_v3 = vpop.f32.mrb[1].mxu0 }
 0x18c   : > { %v378_v4 = vadd.f32 %v377_v3, %v281_v0 }
 0x18d   : > { %858 = vtanh.f32 %v383_v2 }
 0x18e   : > { %860 = vtanh.f32 %v378_v4  ;;  %v757_v6 = vpop.f32.mrb[2].mxu0 }
 0x18f   : > { %v393_v8 = vadd.f32 %v757_v6, %v296_v5  ;;  %v387_v9 = vpop.f32.mrb[3].mxu0 }
 0x190   : > { %v388_v10 = vadd.f32 %v387_v9, %v291_v7 }
 0x191   : > { %862 = vtanh.f32 %v393_v8 }
 0x192   : > { %864 = vtanh.f32 %v388_v10 }
 0x197   : > { %v859_v11 = vpop.eup %858 }
 0x198   : > { %v861_v12 = vpop.eup %860 }
 0x199   : > { %v791_v13 = vpack.c.bf16 %v859_v11, %v861_v12 }
 0x19b   : > { %v863_v14 = vpop.eup %862  ;;  %792 = vmatprep.subr.bf16.mxu1 %v791_v13 }
 0x19c   : > { %v865_v15 = vpop.eup %864  ;;  %794 = vmatpush3.bf16.msra.mxu1 %v791_v13 }
 0x19d   : > { %v795_v16 = vpack.c.bf16 %v863_v14, %v865_v15 }
 0x19f   : > { %796 = vmatprep.subr.bf16.mxu1 %v795_v16 }
 0x1a0   : > { %798 = vmatpush3.bf16.msra.mxu1 %v795_v16 }
 0x1a3   : > { %767 = vmatmul.mubr.msk.f32.vlgmr.msra.gmra.mrb[0].mxu1 %vm298_vm0, %v706_v17 }
 0x1a4   : > { %769 = vmatprep.mubr.msk.f32.mxu1 %vm298_vm0, %v707_v18 }
 0x1a7   : > { %770 = vmatmul.mubr.msk.f32.gmra.mrb[2].mxu1 %vm298_vm0, %v708_v19 }
 0x276   : > { %v768_v24 = vpop.f32.mrb[0].mxu1 }
 0x277   : > { %v514_v25 = vadd.f32 %v768_v24, %v418_v22  ;;  %v508_v26 = vpop.f32.mrb[1].mxu1 }
 0x278   : > { %v509_v27 = vadd.f32 %v508_v26, %v413_v23 }
 0x279   : > { %866 = vtanh.f32 %v514_v25 }
 0x27a   : > { %868 = vtanh.f32 %v509_v27  ;;  %v771_v29 = vpop.f32.mrb[2].mxu1 }
 0x27b   : > { %v524_v31 = vadd.f32 %v771_v29, %v428_v28  ;;  %v518_v32 = vpop.f32.mrb[3].mxu1 }
 0x27c   : > { %v519_v33 = vadd.f32 %v518_v32, %v423_v30 }
 0x27d   : > { %870 = vtanh.f32 %v524_v31 }
 0x27e   : > { %872 = vtanh.f32 %v519_v33 }
 0x283   : > { %v867_v34 = vpop.eup %866 }
 0x284   : > { %v869_v35 = vpop.eup %868 }
 0x285   : > { %v800_v36 = vpack.c.bf16 %v867_v34, %v869_v35 }
 0x287   : > { %v871_v37 = vpop.eup %870  ;;  %801 = vmatpush3.bf16.msra.mxu0 %v800_v36 }
 0x288   : > { %v873_v38 = vpop.eup %872  ;;  %802 = vmatprep.subr.bf16.mxu0 %v939_v20 }
 0x289   : > { %v803_v39 = vpack.c.bf16 %v871_v37, %v873_v38 }
 0x28b   : > { %804 = vmatpush3.bf16.msra.mxu0 %v803_v39 }
 0x28e   : > { %781 = vmatmul.mubr.msk.f32.vlgmr.msra.gmra.mrb[4].mxu0 %vm298_vm0, %v717_v40 }
 0x361   : > { %v609_v42 = vpop.f32.mrb[4].mxu0 }
 0x362   : > { %v610_v43 = vadd.f32 %v609_v42, %v538_v41  ;;  %v782_v44 = vpop.f32.mrb[5].mxu0 }
 0x364   : > { %613 = vst [vmem:[%s160_s10] sm:$0x1] %v610_v43 }
 0x365   : > { %887 = shalt.err (!%p884_p3)
}
 0x366   : > { %s888_s28 = scalar_lea.hbm %s1120_s20, 16  ;;  %s892_s4 = scalar_lea.hbm %s1165_s3, 32 }
 0x367   : > { %p889_p4 = scmp.ne.s32.totalorder %s1120_s20, %s888_s28  ;;  %p893_p9 = scmp.lt.u32.totalorder %s1120_s20, %s1165_s3 }
 0x368   : > { %p894_p10 = scmp.lt.u32.totalorder %s892_s4, %s888_s28  ;;  %p896_p12 = scmp.lt.u32.totalorder %s888_s28, %s1120_s20 }
 0x369   : > { %p890_p7 = pnand %p889_p4, %p1001_p5 }
 0x36a   : > { %p895_p11 = por %p894_p10, %p893_p9 }
 0x36b   : > { %p891_p8 = pneg %p890_p7 }
 0x36c   : > { %p897_p13 = por %p896_p12, %p895_p11 }
 0x36e   : > { %p898_p0 = pnand %p897_p13, %p891_p8 }
 0x370   : > { %901 = shalt.err (!%p898_p0)
}
 0x371   : > { %805 = dma.vmem_to_hbm [thread:$0]  (%p1001_p5), %s1122_s11, 16, %s1120_s20, %s615_s24  }
 0x372 PF: > { %p811_p1 = scmp.ge.s32.totalorder %s936_s15, 2  ;;  %s639_s7 = sand.u32 1, %s924_s12  }
 0x373   : > { %s640_s8 = scalar_lea.sflag [#allocation3], %s639_s7 }
 0x374   : > { %p808_p2 = pnand %p811_p1, %p1005_p6 }
 0x376   : > { %919 = dma.done.wait (!%p808_p2), %s640_s8, 16  }
 0x377   : > { %921 = vsyncadd (!%p808_p2), %s640_s8, 4294967280  ;;  %p13_p3 = scmp.ge.s32.totalorder %s988_s18, 4   ;;  %s1168_s12 = smov %s928_s13 }
 0x378   : > { %s1169_s13 = smov %s932_s14  ;;  %s1170_s14 = smov %s999_s21 }
 0x379   : > { %s1171_s15 = smov %s988_s18  ;;  %15 = sbr.rel (!%p13_p3) target bundleno = 3 (0x3), region = 74 }
 0x380   :  { %644 = vsyncpa [#allocation3], 1 }
 0x381   :  { %646 = vsyncpa [#allocation3 + $0x1], 1 }

</bundles_post_ra>
